<compile_context>
chip_gen: v6e
topology: v6e:2x2x1
jax: 0.10.0
libtpu: 0.0.40
codegen_flags: <defaults>
</compile_context>

<pallas_src>
import functools

import jax
import jax.numpy as jnp
from jax.experimental import pallas as pl
from jax.experimental.pallas import tpu as pltpu


# ---------------------------------------------------------------------------
# Kernel bodies
# ---------------------------------------------------------------------------

def _epilogue(x, b_ref, res_ref, g_ref, beta_ref, o_ref, eps):
    """bias + residual + TF-style LayerNorm (all in f32), store in output dtype."""
    x = x + b_ref[...].astype(jnp.float32)
    # TODO(synk): nn.Dropout is identity in inference mode; training-mode
    # stochastic dropout (pltpu.prng_*) is intentionally not implemented.
    x = x + res_ref[...].astype(jnp.float32)
    u = jnp.mean(x, axis=-1, keepdims=True)
    xc = x - u
    s = jnp.mean(xc * xc, axis=-1, keepdims=True)
    inv = jax.lax.rsqrt(s + jnp.float32(eps))
    y = xc * inv * g_ref[...].astype(jnp.float32) + beta_ref[...].astype(jnp.float32)
    o_ref[...] = y.astype(o_ref.dtype)


def _bert_output_kernel_resident(h_ref, w_ref, b_ref, res_ref, g_ref, beta_ref,
                                 o_ref, *, eps, compute_dtype, precision):
    """1-D grid over row tiles; whole W^T resident in VMEM."""
    x = jnp.dot(h_ref[...].astype(compute_dtype), w_ref[...],
                preferred_element_type=jnp.float32, precision=precision)
    _epilogue(x, b_ref, res_ref, g_ref, beta_ref, o_ref, eps)


def _bert_output_kernel_ksplit(h_ref, w_ref, b_ref, res_ref, g_ref, beta_ref,
                               o_ref, acc_ref, *, eps, compute_dtype, precision):
    """Grid = (rows, K). acc_ref is a (TM, H) f32 accumulator resident across K."""
    k = pl.program_id(1)
    part = jnp.dot(h_ref[...].astype(compute_dtype), w_ref[...],
                   preferred_element_type=jnp.float32, precision=precision)

    @pl.when(k == 0)
    def _():
        acc_ref[...] = part          # direct store: no zero-fill + RMW on step 0

    @pl.when(k > 0)
    def _():
        acc_ref[...] += part

    @pl.when(k == pl.num_programs(1) - 1)
    def _():
        _epilogue(acc_ref[...], b_ref, res_ref, g_ref, beta_ref, o_ref, eps)


# ---------------------------------------------------------------------------
# Wrapper
# ---------------------------------------------------------------------------

def _round_up(x, m):
    return ((x + m - 1) // m) * m


def bert_output(hidden_states, input_tensor, w, b, gamma, beta, *,
                eps=1e-12, hidden_dropout_prob=0.0,
                w_is_transposed=False, compute_dtype=jnp.bfloat16,
                precision=None, block_rows=None, block_k=None,
                vmem_limit_bytes=None):
    """Pallas equivalent of BertOutput.forward (inference mode).

    hidden_states: [..., I]
    input_tensor : [..., H]   (residual)
    w            : [H, I] (torch convention) or [I, H] if w_is_transposed=True
                   (prefer pre-transposing once at weight-load time).
    b, gamma, beta: [H]
    compute_dtype: dtype fed to the MXU (bf16 default; accumulation stays f32).
    precision    : pass jax.lax.Precision.HIGHEST with compute_dtype=float32 for
                   exact-f32 matmul accumulation.
    Returns [..., H] with the dtype of input_tensor.
    """
    del hidden_dropout_prob  # identity in eval mode (see TODO in kernel)

    *lead, I = hidden_states.shape
    H = input_tensor.shape[-1]
    M = 1
    for d in lead:
        M *= int(d)

    if w_is_transposed:
        assert w.shape == (I, H), w.shape
        w_t = w
    else:
        assert w.shape == (H, I), w.shape
        w_t = jnp.transpose(w)   # done once per call; ideally hoist to load time

    if compute_dtype is None:
        compute_dtype = hidden_states.dtype
    w_t = w_t.astype(compute_dtype)              # once per call (tiny for bf16)

    h2 = hidden_states.reshape(M, I)
    r2 = input_tensor.reshape(M, H)
    b2 = b.reshape(1, H)
    g2 = gamma.reshape(1, H)
    beta2 = beta.reshape(1, H)

    # --- VMEM budget (generation aware: ~96 MiB v5e/v6e, ~48 MiB v7x) ---
    if vmem_limit_bytes is None:
        cap = 64 * 1024 * 1024
        try:
            info = pltpu.get_tpu_info()
            cap = int(getattr(info, "vmem_capacity_bytes", cap) or cap)
        except Exception:
            pass
        vmem_limit_bytes = (cap * 3) // 4

    # --- row tiling ---
    if block_rows is None:
        block_rows = min(512, _round_up(M, 16))
        # >= 2 row tiles when M allows, so megacore (v7x) has work for both TCs.
        if M >= 32 and pl.cdiv(M, block_rows) < 2:
            block_rows = max(16, _round_up(pl.cdiv(M, 2), 16))
    else:
        block_rows = max(16, _round_up(block_rows, 16))

    sz_h = jnp.dtype(h2.dtype).itemsize
    sz_r = jnp.dtype(r2.dtype).itemsize
    sz_o = jnp.dtype(input_tensor.dtype).itemsize
    sz_c = jnp.dtype(compute_dtype).itemsize

    def _row_tile_bytes(br, bk):
        return (2 * br * bk * sz_h          # hidden_states double buffer
                + 2 * br * H * sz_r         # residual double buffer
                + 2 * br * H * sz_o         # output double buffer
                + br * H * 4)               # f32 accumulator (K-split only)

    w_resident_bytes = 2 * I * H * sz_c     # conservatively assume double-buffered
    resident = ((block_k is None or block_k == I)
                and w_resident_bytes <= vmem_limit_bytes // 2)

    if resident:
        while (w_resident_bytes + _row_tile_bytes(block_rows, I)
               > int(vmem_limit_bytes * 0.9)) and block_rows > 16:
            block_rows = max(16, _round_up(block_rows // 2, 16))
    else:
        if block_k is None:
            block_k = next((c for c in (2048, 1024, 512, 256, 128) if I % c == 0), I)
        assert I % block_k == 0, "intermediate_size must be divisible by block_k"
        while (2 * block_k * H * sz_c + _row_tile_bytes(block_rows, block_k)
               > int(vmem_limit_bytes * 0.9)) and block_rows > 16:
            block_rows = max(16, _round_up(block_rows // 2, 16))

    out_shape = jax.ShapeDtypeStruct((M, H), input_tensor.dtype)
    n_row_tiles = pl.cdiv(M, block_rows)

    if resident:
        kernel = functools.partial(_bert_output_kernel_resident, eps=eps,
                                   compute_dtype=compute_dtype, precision=precision)
        out = pl.pallas_call(
            kernel,
            out_shape=out_shape,
            grid_spec=pltpu.PrefetchScalarGridSpec(
                num_scalar_prefetch=0,
                grid=(n_row_tiles,),
                in_specs=[
                    pl.BlockSpec((block_rows, I), lambda i: (i, 0)),   # hidden
                    pl.BlockSpec((I, H), lambda i: (0, 0)),            # W^T (resident)
                    pl.BlockSpec((1, H), lambda i: (0, 0)),            # bias
                    pl.BlockSpec((block_rows, H), lambda i: (i, 0)),   # residual
                    pl.BlockSpec((1, H), lambda i: (0, 0)),            # gamma
                    pl.BlockSpec((1, H), lambda i: (0, 0)),            # beta
                ],
                out_specs=pl.BlockSpec((block_rows, H), lambda i: (i, 0)),
            ),
            compiler_params=pltpu.CompilerParams(
                dimension_semantics=("parallel",),
                vmem_limit_bytes=int(vmem_limit_bytes),
            ),
        )(h2, w_t, b2, r2, g2, beta2)
    else:
        kernel = functools.partial(_bert_output_kernel_ksplit, eps=eps,
                                   compute_dtype=compute_dtype, precision=precision)
        out = pl.pallas_call(
            kernel,
            out_shape=out_shape,
            grid_spec=pltpu.PrefetchScalarGridSpec(
                num_scalar_prefetch=0,
                grid=(n_row_tiles, I // block_k),
                in_specs=[
                    pl.BlockSpec((block_rows, block_k), lambda i, k: (i, k)),  # hidden
                    pl.BlockSpec((block_k, H), lambda i, k: (k, 0)),           # W^T slice
                    pl.BlockSpec((1, H), lambda i, k: (0, 0)),                 # bias
                    pl.BlockSpec((block_rows, H), lambda i, k: (i, 0)),        # residual
                    pl.BlockSpec((1, H), lambda i, k: (0, 0)),                 # gamma
                    pl.BlockSpec((1, H), lambda i, k: (0, 0)),                 # beta
                ],
                out_specs=pl.BlockSpec((block_rows, H), lambda i, k: (i, 0)),
                scratch_shapes=[pltpu.VMEM((block_rows, H), jnp.float32)],
            ),
            compiler_params=pltpu.CompilerParams(
                dimension_semantics=("parallel", "arbitrary"),
                vmem_limit_bytes=int(vmem_limit_bytes),
            ),
        )(h2, w_t, b2, r2, g2, beta2)

    return out.reshape(*lead, H)


# ---------------------------------------------------------------------------
# Pure-JAX reference (BertOutput.forward, eval mode)
# ---------------------------------------------------------------------------

def _reference(hidden_states, input_tensor, w_t, b, gamma, beta, eps,
               matmul_dtype=None):
    h = hidden_states
    wt = w_t
    if matmul_dtype is not None:
        h = h.astype(matmul_dtype)
        wt = wt.astype(matmul_dtype)
    else:
        h = h.astype(jnp.float32)
        wt = wt.astype(jnp.float32)
    x = jnp.dot(h, wt, preferred_element_type=jnp.float32,
                precision=jax.lax.Precision.HIGHEST)
    x = x + b.astype(jnp.float32)
    x = x + input_tensor.astype(jnp.float32)
    u = jnp.mean(x, axis=-1, keepdims=True)
    s = jnp.mean((x - u) ** 2, axis=-1, keepdims=True)
    xn = (x - u) / jnp.sqrt(s + eps)
    return gamma.astype(jnp.float32) * xn + beta.astype(jnp.float32)


# ---------------------------------------------------------------------------
# Self-test
# ---------------------------------------------------------------------------

if __name__ == "__main__":
    key = jax.random.PRNGKey(0)
    k1, k2, k3, k4, k5, k6 = jax.random.split(key, 6)

    # Small BertOutput-like shapes: batch=2, seq=8, intermediate=512, hidden=128.
    B, S, I, H = 2, 8, 512, 128
    eps = 1e-12

    hidden_states = jax.random.normal(k1, (B, S, I), dtype=jnp.float32)
    input_tensor = jax.random.normal(k2, (B, S, H), dtype=jnp.float32)
    w = jax.random.normal(k3, (H, I), dtype=jnp.float32) * 0.02
    w_t = jnp.transpose(w)  # pre-transpose once, emulating load-time conversion
    b = jax.random.normal(k4, (H,), dtype=jnp.float32) * 0.02
    gamma = 1.0 + 0.1 * jax.random.normal(k5, (H,), dtype=jnp.float32)
    beta = 0.1 * jax.random.normal(k6, (H,), dtype=jnp.float32)

    ref32 = _reference(hidden_states, input_tensor, w_t, b, gamma, beta, eps)
    refbf = _reference(hidden_states, input_tensor, w_t, b, gamma, beta, eps,
                       matmul_dtype=jnp.bfloat16)

    # 1) Default path: resident W, bf16 MXU operands, f32 accumulate/epilogue.
    out = bert_output(hidden_states, input_tensor, w_t, b, gamma, beta,
                      eps=eps, w_is_transposed=True)
    jax.block_until_ready(out)
    assert out.shape == (B, S, H), out.shape
    assert jnp.allclose(out, refbf, rtol=2e-3, atol=2e-3), \
        float(jnp.max(jnp.abs(out - refbf)))
    assert jnp.allclose(out, ref32, rtol=5e-2, atol=5e-2), \
        float(jnp.max(jnp.abs(out - ref32)))

    # 2) K-split fallback path (block_k < I forces the (rows, K) grid).
    out_ks = bert_output(hidden_states, input_tensor, w_t, b, gamma, beta,
                         eps=eps, w_is_transposed=True, block_k=256)
    jax.block_until_ready(out_ks)
    assert jnp.allclose(out_ks, refbf, rtol=2e-3, atol=2e-3), \
        float(jnp.max(jnp.abs(out_ks - refbf)))

    # 3) Partial row block (M = 14, not a multiple of the 16-row tile).
    hs7, it7 = hidden_states[:, :7], input_tensor[:, :7]
    out7 = bert_output(hs7, it7, w_t, b, gamma, beta, eps=eps, w_is_transposed=True)
    jax.block_until_ready(out7)
    assert out7.shape == (B, 7, H), out7.shape
    assert jnp.allclose(out7, refbf[:, :7], rtol=2e-3, atol=2e-3), \
        float(jnp.max(jnp.abs(out7 - refbf[:, :7])))

    # 4) f32 MXU operands (previous behavior) for tighter numerics.
    out32 = bert_output(hidden_states, input_tensor, w_t, b, gamma, beta,
                        eps=eps, w_is_transposed=True,
                        compute_dtype=jnp.float32)
    jax.block_until_ready(out32)
    assert jnp.allclose(out32, ref32, rtol=1e-3, atol=1e-3), \
        float(jnp.max(jnp.abs(out32 - ref32)))

    print("KERNEL_OK")
</pallas_src>

<mosaic_0001>
module attributes {stable_mosaic.version = 11 : i64} {
  func.func @_bert_output_kernel_resident(%arg0: i32, %arg1: memref<16x512xf32, #tpu.memory_space<vmem>>, %arg2: memref<512x128xbf16, #tpu.memory_space<vmem>>, %arg3: memref<1x128xf32, #tpu.memory_space<vmem>>, %arg4: memref<16x128xf32, #tpu.memory_space<vmem>>, %arg5: memref<1x128xf32, #tpu.memory_space<vmem>>, %arg6: memref<1x128xf32, #tpu.memory_space<vmem>>, %arg7: memref<16x128xf32, #tpu.memory_space<vmem>>) attributes {dimension_semantics = [#tpu.dimension_semantics<parallel>], iteration_bounds = array<i64: 1>, scalar_prefetch = 0 : i64, scratch_operands = 0 : i64, tpu.core_type = #tpu.core_type<tc>, window_params = [{transform_indices = @transform_0, window_bounds = array<i64: 16, 512>}, {pipeline_mode = #tpu.pipeline_mode<synchronous>, transform_indices = @transform_1, window_bounds = array<i64: 512, 128>}, {pipeline_mode = #tpu.pipeline_mode<synchronous>, transform_indices = @transform_2, window_bounds = array<i64: 1, 128>}, {transform_indices = @transform_3, window_bounds = array<i64: 16, 128>}, {pipeline_mode = #tpu.pipeline_mode<synchronous>, transform_indices = @transform_4, window_bounds = array<i64: 1, 128>}, {pipeline_mode = #tpu.pipeline_mode<synchronous>, transform_indices = @transform_5, window_bounds = array<i64: 1, 128>}, {transform_indices = @transform_6, window_bounds = array<i64: 16, 128>}]} {
    %c0 = arith.constant 0 : index
    %c0_0 = arith.constant 0 : index
    %0 = vector.load %arg1[%c0, %c0_0] : memref<16x512xf32, #tpu.memory_space<vmem>>, vector<16x512xf32>
    %1 = arith.truncf %0 : vector<16x512xf32> to vector<16x512xbf16>
    %c0_1 = arith.constant 0 : index
    %c0_2 = arith.constant 0 : index
    %2 = vector.load %arg2[%c0_1, %c0_2] : memref<512x128xbf16, #tpu.memory_space<vmem>>, vector<512x128xbf16>
    %cst = arith.constant dense<0.000000e+00> : vector<16x128xf32>
    %3 = tpu.matmul %1, %2, %cst {dimension_numbers = #tpu.dot_dimension_numbers<[1], [0], [0], [1], [0, 0, 1, 1], [], []>} : vector<16x512xbf16>, vector<512x128xbf16>, vector<16x128xf32> -> vector<16x128xf32>
    %c0_3 = arith.constant 0 : index
    %c0_4 = arith.constant 0 : index
    %4 = vector.load %arg3[%c0_3, %c0_4] : memref<1x128xf32, #tpu.memory_space<vmem>>, vector<1x128xf32>
    %5 = vector.broadcast %4 : vector<1x128xf32> to vector<16x128xf32>
    %6 = arith.addf %3, %5 : vector<16x128xf32>
    %c0_5 = arith.constant 0 : index
    %c0_6 = arith.constant 0 : index
    %7 = vector.load %arg4[%c0_5, %c0_6] : memref<16x128xf32, #tpu.memory_space<vmem>>, vector<16x128xf32>
    %8 = arith.addf %6, %7 : vector<16x128xf32>
    %cst_7 = arith.constant dense<0.000000e+00> : vector<16xf32>
    %9 = vector.multi_reduction <add>, %8, %cst_7 [1] : vector<16x128xf32> to vector<16xf32>
    %10 = vector.shape_cast %9 : vector<16xf32> to vector<16x1xf32>
    %cst_8 = arith.constant 1.280000e+02 : f32
    %11 = vector.broadcast %cst_8 : f32 to vector<16x1xf32>
    %12 = arith.divf %10, %11 : vector<16x1xf32>
    %13 = vector.broadcast %12 : vector<16x1xf32> to vector<16x128xf32>
    %14 = arith.subf %8, %13 : vector<16x128xf32>
    %15 = arith.mulf %14, %14 : vector<16x128xf32>
    %cst_9 = arith.constant dense<0.000000e+00> : vector<16xf32>
    %16 = vector.multi_reduction <add>, %15, %cst_9 [1] : vector<16x128xf32> to vector<16xf32>
    %17 = vector.shape_cast %16 : vector<16xf32> to vector<16x1xf32>
    %cst_10 = arith.constant 1.280000e+02 : f32
    %18 = vector.broadcast %cst_10 : f32 to vector<16x1xf32>
    %19 = arith.divf %17, %18 : vector<16x1xf32>
    %cst_11 = arith.constant 9.99999996E-13 : f32
    %20 = vector.broadcast %cst_11 : f32 to vector<16x1xf32>
    %21 = arith.addf %19, %20 : vector<16x1xf32>
    %22 = math.rsqrt %21 : vector<16x1xf32>
    %23 = vector.broadcast %22 : vector<16x1xf32> to vector<16x128xf32>
    %24 = arith.mulf %14, %23 : vector<16x128xf32>
    %c0_12 = arith.constant 0 : index
    %c0_13 = arith.constant 0 : index
    %25 = vector.load %arg5[%c0_12, %c0_13] : memref<1x128xf32, #tpu.memory_space<vmem>>, vector<1x128xf32>
    %26 = vector.broadcast %25 : vector<1x128xf32> to vector<16x128xf32>
    %27 = arith.mulf %24, %26 : vector<16x128xf32>
    %c0_14 = arith.constant 0 : index
    %c0_15 = arith.constant 0 : index
    %28 = vector.load %arg6[%c0_14, %c0_15] : memref<1x128xf32, #tpu.memory_space<vmem>>, vector<1x128xf32>
    %29 = vector.broadcast %28 : vector<1x128xf32> to vector<16x128xf32>
    %30 = arith.addf %27, %29 : vector<16x128xf32>
    %c0_16 = arith.constant 0 : index
    %c0_17 = arith.constant 0 : index
    %31 = vector.load %arg7[%c0_16, %c0_17] : memref<16x128xf32, #tpu.memory_space<vmem>>, vector<16x128xf32>
    tpu.vector_store %arg7[%c0_16, %c0_17], %30 {strides = array<i32>} : memref<16x128xf32, #tpu.memory_space<vmem>>, vector<16x128xf32>,
    return
  }
  func.func @transform_0(%arg0: i32) -> (i32, i32) {
    %c0_i32 = arith.constant 0 : i32
    %c0_i32_0 = arith.constant 0 : i32
    return %arg0, %c0_i32 : i32, i32
  }
  func.func @transform_1(%arg0: i32) -> (i32, i32) {
    %c0_i32 = arith.constant 0 : i32
    %c0_i32_0 = arith.constant 0 : i32
    %c0_i32_1 = arith.constant 0 : i32
    return %c0_i32, %c0_i32_0 : i32, i32
  }
  func.func @transform_2(%arg0: i32) -> (i32, i32) {
    %c0_i32 = arith.constant 0 : i32
    %c0_i32_0 = arith.constant 0 : i32
    %c0_i32_1 = arith.constant 0 : i32
    return %c0_i32, %c0_i32_0 : i32, i32
  }
  func.func @transform_3(%arg0: i32) -> (i32, i32) {
    %c0_i32 = arith.constant 0 : i32
    %c0_i32_0 = arith.constant 0 : i32
    return %arg0, %c0_i32 : i32, i32
  }
  func.func @transform_4(%arg0: i32) -> (i32, i32) {
    %c0_i32 = arith.constant 0 : i32
    %c0_i32_0 = arith.constant 0 : i32
    %c0_i32_1 = arith.constant 0 : i32
    return %c0_i32, %c0_i32_0 : i32, i32
  }
  func.func @transform_5(%arg0: i32) -> (i32, i32) {
    %c0_i32 = arith.constant 0 : i32
    %c0_i32_0 = arith.constant 0 : i32
    %c0_i32_1 = arith.constant 0 : i32
    return %c0_i32, %c0_i32_0 : i32, i32
  }
  func.func @transform_6(%arg0: i32) -> (i32, i32) {
    %c0_i32 = arith.constant 0 : i32
    %c0_i32_0 = arith.constant 0 : i32
    return %arg0, %c0_i32 : i32, i32
  }
}

</mosaic_0001>

<bundles_post_ra>
// kernel: tpu_custom_call.1
= control target key start
LH: loop header
LB: loop body
LE: loop exit
PB: predicated region body
PF: predicated region fallthrough
CT: control target
= control target key end

     0   :  { %11 = vsyncpa [#allocation3], 0  ;;  %s771_s0 = inlined_call_operand.hbm [shape: f32[16,512], index: 0, kind: input, shape index: {}]   ;;  %s772_s1 = inlined_call_operand.hbm [shape: bf16[512,128], index: 1, kind: input, shape index: {}]   ;;  %s773_s2 = inlined_call_operand.vmem [shape: f32[1,128], index: 2, kind: input, shape index: {}]   ;;  %s774_s3 = inlined_call_operand.hbm [shape: f32[16,128], index: 3, kind: input, shape index: {}]   ;;  %s775_s4 = inlined_call_operand.vmem [shape: f32[1,128], index: 4, kind: input, shape index: {}]   ;;  %s776_s5 = inlined_call_operand.vmem [shape: f32[1,128], index: 5, kind: input, shape index: {}]   ;;  %s777_s6 = inlined_call_operand.hbm [shape: f32[16,128], index: 6, kind: output, shape index: {}]  }
   0x1   :  { %12 = vsyncpa [#allocation6], 0 }
   0x2   :  { %13 = vsyncpa [#allocation4], 0  ;;  %s699_s21 = smov [#allocation5]  }
   0x3   :  { %s31_s22 = sshll.u32 %s699_s21, 4  ;;  %s32_s22 = int_to_ptr.vmem [resolvable:$true] %s31_s22 }
   0x4   :  { %s621_s23 = scalar_lea.vmem %s32_s22, 4096  ;;  %p626_p1 = scmp.lt.s32.totalorder %s32_s22, %s32_s22 }
   0x5   :  { %p622_p0 = scmp.ne.s32.totalorder %s32_s22, %s621_s23  ;;  %p627_p2 = scmp.lt.s32.totalorder %s621_s23, %s621_s23 }
   0x7   :  { %p628_p3 = por %p627_p2, %p626_p1 }
   0x9   :  { %p629_p4 = pnand %p628_p3, %p622_p0 }
   0xb   :  { %632 = shalt.err (!%p629_p4)
}
   0xc   :  { %s700_s24 = smov 64   ;;  %s701_s25 = smov 4  }
   0xd   :  { %37 = dma.hbm_to_vmem [thread:$0]  %s772_s1, 4096, %s32_s22, [#allocation6], %s700_s24, %s700_s24, %s701_s25  }
   0xe   :  { %s702_s28 = smov [#allocation2]  }
   0xf   :  { %s19_s29 = sshll.u32 %s702_s28, 4  ;;  %s20_s29 = int_to_ptr.vmem [resolvable:$true] %s19_s29 }
  0x10   :  { %s641_s30 = scalar_lea.vmem %s20_s29, 1024  ;;  %p646_p6 = scmp.lt.s32.totalorder %s20_s29, %s20_s29 }
  0x11   :  { %p642_p5 = scmp.ne.s32.totalorder %s20_s29, %s641_s30  ;;  %p647_p7 = scmp.lt.s32.totalorder %s641_s30, %s641_s30 }
  0x13   :  { %p648_p8 = por %p647_p7, %p646_p6 }
  0x15   :  { %p649_p9 = pnand %p648_p8, %p642_p5 }
  0x17   :  { %652 = shalt.err (!%p649_p9)
}
  0x18   :  { %s703_s7 = smov 512   ;;  %s704_s8 = smov 32  }
  0x19   :  { %25 = dma.hbm_to_vmem [thread:$0]  %s771_s0, 1024, %s20_s29, [#allocation3], %s703_s7, %s703_s7, %s704_s8  }
  0x1a   :  { %s705_s11 = smov [#allocation7]  }
  0x1b   :  { %s45_s12 = sshll.u32 %s705_s11, 4  ;;  %s46_s12 = int_to_ptr.vmem [resolvable:$true] %s45_s12 }
  0x1c   :  { %s661_s1 = scalar_lea.vmem %s46_s12, 256  ;;  %p666_p11 = scmp.lt.s32.totalorder %s46_s12, %s46_s12 }
  0x1d   :  { %p662_p10 = scmp.ne.s32.totalorder %s46_s12, %s661_s1  ;;  %p667_p12 = scmp.lt.s32.totalorder %s661_s1, %s661_s1 }
  0x1f   :  { %p668_p13 = por %p667_p12, %p666_p11 }
  0x21   :  { %p669_p0 = pnand %p668_p13, %p662_p10 }
  0x23   :  { %672 = shalt.err (!%p669_p0)
}
  0x24   :  { %s706_s13 = smov 128   ;;  %s707_s14 = smov 8  }
  0x25   :  { %51 = dma.hbm_to_vmem [thread:$0]  %s774_s3, 256, %s46_s12, [#allocation6], %s706_s13, %s706_s13, %s707_s14  }
  0x26   :  { %693 = dma.done.wait [#allocation3], 1024  }
  0x27   :  { %694 = vsyncadd [#allocation3], 4294966272 }
  0x28   :  { %695 = dma.done.wait [#allocation6], 4352  }
  0x29   :  { %696 = vsyncadd [#allocation6], 4294962944  ;;  %v577_v0 = vld [vmem:[#allocation5 + $0x78] sm:$0xff]   ;;  %v581_v4 = vld [vmem:[#allocation5 + $0x70] sm:$0xff]   ;;  %s708_s20 = smov [#allocation8]  }
  0x2a   :  { %v578_v1 = vld [vmem:[#allocation5 + $0xf8] sm:$0xff]   ;;  %523 = vmatprep.subr.bf16.mxu0 %v577_v0  ;;  %v582_v5 = vld [vmem:[#allocation5 + $0xf0] sm:$0xff]   ;;  %v585_v8 = vld [vmem:[#allocation5 + $0x68] sm:$0xff]   ;;  %s475_s21 = sshll.u32 %s708_s20, 4  ;;  %s476_s21 = int_to_ptr.vmem [resolvable:$true] %s475_s21 }
  0x2b   :  { %v579_v2 = vld [vmem:[#allocation5 + $0x38] sm:$0xff]   ;;  %545 = vmatprep.subr.bf16.mxu1 %v578_v1  ;;  %v583_v6 = vld [vmem:[#allocation5 + $0x30] sm:$0xff]   ;;  %v586_v9 = vld [vmem:[#allocation5 + $0xe8] sm:$0xff]   ;;  %s673_s22 = scalar_lea.vmem %s476_s21, 256  ;;  %p678_p2 = scmp.lt.s32.totalorder %s476_s21, %s476_s21 }
  0x2c   :  { %v580_v3 = vld [vmem:[#allocation5 + $0xb8] sm:$0xff]   ;;  %524 = vmatpush3.bf16.msra.mxu0 %v579_v2  ;;  %v584_v7 = vld [vmem:[#allocation5 + $0xb0] sm:$0xff]   ;;  %v587_v10 = vld [vmem:[#allocation5 + $0x28] sm:$0xff]   ;;  %p674_p1 = scmp.ne.s32.totalorder %s476_s21, %s673_s22  ;;  %p679_p3 = scmp.lt.s32.totalorder %s673_s22, %s673_s22 }
  0x2d   :  { %546 = vmatpush3.bf16.msra.mxu1 %v580_v3  ;;  %525 = vmatprep.subr.bf16.mxu0 %v581_v4  ;;  %v588_v11 = vld [vmem:[#allocation5 + $0xa8] sm:$0xff]   ;;  %v589_v12 = vld [vmem:[#allocation5 + $0x60] sm:$0xff]   ;;  %v593_v16 = vld [vmem:[#allocation5 + $0x58] sm:$0xff]  }
  0x2e   :  { %547 = vmatprep.subr.bf16.mxu1 %v582_v5  ;;  %v590_v13 = vld [vmem:[#allocation5 + $0xe0] sm:$0xff]   ;;  %v594_v17 = vld [vmem:[#allocation5 + $0xd8] sm:$0xff]   ;;  %v597_v20 = vld [vmem:[#allocation5 + $0x50] sm:$0xff]   ;;  %p680_p4 = por %p679_p3, %p678_p2 }
  0x2f   :  { %v591_v14 = vld [vmem:[#allocation5 + $0x20] sm:$0xff]   ;;  %v595_v18 = vld [vmem:[#allocation5 + $0x18] sm:$0xff]   ;;  %v598_v21 = vld [vmem:[#allocation5 + $0xd0] sm:$0xff]  }
  0x30   :  { %526 = vmatpush3.bf16.msra.mxu0 %v583_v6  ;;  %v592_v15 = vld [vmem:[#allocation5 + $0xa0] sm:$0xff]   ;;  %v596_v19 = vld [vmem:[#allocation5 + $0x98] sm:$0xff]   ;;  %v599_v22 = vld [vmem:[#allocation5 + $0x10] sm:$0xff]   ;;  %p681_p5 = pnand %p680_p4, %p674_p1 }
  0x31   :  { %548 = vmatpush3.bf16.msra.mxu1 %v584_v7  ;;  %527 = vmatprep.subr.bf16.mxu0 %v585_v8  ;;  %v600_v23 = vld [vmem:[#allocation5 + $0x90] sm:$0xff]   ;;  %v601_v24 = vld [vmem:[#allocation5 + $0x48] sm:$0xff]   ;;  %v605_v28 = vld [vmem:[#allocation5 + $0x40] sm:$0xff]  }
  0x32   :  { %549 = vmatprep.subr.bf16.mxu1 %v586_v9  ;;  %v602_v25 = vld [vmem:[#allocation5 + $0xc8] sm:$0xff]   ;;  %v606_v29 = vld [vmem:[#allocation5 + $0xc0] sm:$0xff]   ;;  %v69_v34 = vld [vmem:[#allocation2 + $0x18] sm:$0xff] }
  0x33   :  { %v603_v26 = vld [vmem:[#allocation5 + $0x8] sm:$0xff]   ;;  %v607_v30 = vld [vmem:[#allocation5] sm:$0xff]   ;;  %v73_v36 = vld [vmem:[#allocation2 + $0x38] sm:$0xff] }
  0x34   :  { %528 = vmatpush3.bf16.msra.mxu0 %v587_v10  ;;  %v604_v27 = vld [vmem:[#allocation5 + $0x88] sm:$0xff]   ;;  %v608_v31 = vld [vmem:[#allocation5 + $0x80] sm:$0xff]   ;;  %v77_v39 = vpack.c.bf16 %v73_v36, %v69_v34  ;;  %v68_v41 = vld [vmem:[#allocation2 + $0x10] sm:$0xff] }
  0x35   :  { %550 = vmatpush3.bf16.msra.mxu1 %v588_v11  ;;  %529 = vmatprep.subr.bf16.mxu0 %v589_v12  ;;  %v67_v32 = vld [vmem:[#allocation2 + $0x8] sm:$0xff]  ;;  %v66_v37 = vld [vmem:[#allocation2] sm:$0xff]  ;;  %v72_v42 = vld [vmem:[#allocation2 + $0x30] sm:$0xff] }
  0x36   :  { %551 = vmatprep.subr.bf16.mxu1 %v590_v13  ;;  %v71_v33 = vld [vmem:[#allocation2 + $0x28] sm:$0xff]  ;;  %v70_v38 = vld [vmem:[#allocation2 + $0x20] sm:$0xff]  ;;  %v76_v43 = vpack.c.bf16 %v72_v42, %v68_v41  ;;  %414 = vmatprep.mubr.bf16.mxu1 %v77_v39 }
  0x37   :  { %v75_v35 = vpack.c.bf16 %v71_v33, %v67_v32  ;;  %v74_v40 = vpack.c.bf16 %v70_v38, %v66_v37  ;;  %v488_v46 = vld [vmem:[%s773_s2] ss:$0 sm:$0xff]  ;;  %v424_v62 = vld [vmem:[#allocation7 + $0x8] sm:$0xff] }
  0x38   :  { %530 = vmatpush3.bf16.msra.mxu0 %v591_v14  ;;  %v423_v55 = vld [vmem:[#allocation7] sm:$0xff] }
  0x39   :  { %552 = vmatpush3.bf16.msra.mxu1 %v592_v15  ;;  %531 = vmatprep.subr.bf16.mxu0 %v593_v16  ;;  %v521_v16 = vld [vmem:[%s775_s4] ss:$0 sm:$0xff] }
  0x3a   :  { %553 = vmatprep.subr.bf16.mxu1 %v594_v17  ;;  %373 = vmatprep.mubr.bf16.mxu0 %v75_v35 }
  0x3c   :  { %532 = vmatpush3.bf16.msra.mxu0 %v595_v18  ;;  %v522_v18 = vld [vmem:[%s776_s5] ss:$0 sm:$0xff] }
  0x3d   :  { %554 = vmatpush3.bf16.msra.mxu1 %v596_v19  ;;  %533 = vmatprep.subr.bf16.mxu0 %v597_v20 }
  0x3e   :  { %555 = vmatprep.subr.bf16.mxu1 %v598_v21 }
  0x40   :  { %534 = vmatpush3.bf16.msra.mxu0 %v599_v22 }
  0x41   :  { %556 = vmatpush3.bf16.msra.mxu1 %v600_v23  ;;  %535 = vmatprep.subr.bf16.mxu0 %v601_v24 }
  0x42   :  { %557 = vmatprep.subr.bf16.mxu1 %v602_v25 }
  0x44   :  { %536 = vmatpush3.bf16.msra.mxu0 %v603_v26 }
  0x45   :  { %558 = vmatpush3.bf16.msra.mxu1 %v604_v27  ;;  %537 = vmatprep.subr.bf16.mxu0 %v605_v28 }
  0x46   :  { %559 = vmatprep.subr.bf16.mxu1 %v606_v29 }
  0x48   :  { %538 = vmatpush3.bf16.msra.mxu0 %v607_v30 }
  0x49   :  { %560 = vmatpush3.bf16.msra.mxu1 %v608_v31 }
  0x4b   :  { %374 = vmatmul.mubr.bf16.vlgmr.msra.gmra.mxu0 %v74_v40 }
  0x4c   :  { %415 = vmatmul.mubr.bf16.vlgmr.msra.gmra.mxu1 %v76_v43 }
 0x10b   :  { %v539_v44 = vpop.f32.mrf.mxu0 }
 0x10c   :  { %v561_v45 = vpop.f32.mrf.mxu1 }
 0x10d   :  { %v540_v47 = vpop.f32.mrf.mxu0 }
 0x10e   :  { %v541_v48 = vadd.f32 %v540_v47, %v539_v44  ;;  %v562_v49 = vpop.f32.mrf.mxu1 }
 0x10f   :  { %v542_v50 = vpop.f32.mrf.mxu0  ;;  %v563_v52 = vadd.f32 %v562_v49, %v561_v45 }
 0x110   :  { %v376_v51 = vadd.f32 %v541_v48, %v488_v46  ;;  %v564_v53 = vpop.f32.mrf.mxu1 }
 0x111   :  { %v543_v54 = vpop.f32.mrf.mxu0 }
 0x112   :  { %v417_v56 = vadd.f32 %v563_v52, %v376_v51  ;;  %v544_v57 = vadd.f32 %v543_v54, %v542_v50  ;;  %v565_v58 = vpop.f32.mrf.mxu1 }
 0x113   :  { %v566_v60 = vadd.f32 %v565_v58, %v564_v53 }
 0x114   :  { %v379_v59 = vadd.f32 %v544_v57, %v488_v46  ;;  %v425_v61 = vadd.f32 %v423_v55, %v417_v56 }
 0x116   :  { %v420_v63 = vadd.f32 %v566_v60, %v379_v59  ;;  %427 = vadd.xlane.f32.xlu0 %v425_v61 }
 0x118   :  { %v426_v0 = vadd.f32 %v424_v62, %v420_v63 }
 0x11a   :  { %429 = vadd.xlane.f32.xlu0 %v426_v0 }
 0x19f   :  { %v428_v1 = vpop.xlane.xlu0 %427 }
 0x1a0   :  { %v432_v2 = vmul.f32 0.0078125, %v428_v1 }
 0x1a2   :  { %v434_v3 = vsub.f32 %v425_v61, %v432_v2 }
 0x1a3   :  { %v430_v4 = vpop.xlane.xlu0 %429 }
 0x1a4   :  { %v433_v5 = vmul.f32 0.0078125, %v430_v4  ;;  %v436_v6 = vmul.f32 %v434_v3, %v434_v3 }
 0x1a6   :  { %v435_v7 = vsub.f32 %v426_v0, %v433_v5  ;;  %438 = vadd.xlane.f32.xlu1 %v436_v6 }
 0x1a8   :  { %v437_v8 = vmul.f32 %v435_v7, %v435_v7 }
 0x1aa   :  { %440 = vadd.xlane.f32.xlu1 %v437_v8 }
 0x22f   :  { %v439_v9 = vpop.xlane.xlu1 %438 }
 0x230   :  { %v442_v10 = vmul.f32 0.0078125, %v439_v9 }
 0x232   :  { %v444_v11 = vadd.f32 1e-12, %v442_v10 }
 0x233   :  { %v441_v12 = vpop.xlane.xlu1 %440 }
 0x234   :  { %609 = vrsqrt.f32 %v444_v11  ;;  %v443_v13 = vmul.f32 0.0078125, %v441_v12 }
 0x236   :  { %v445_v14 = vadd.f32 1e-12, %v443_v13 }
 0x238   :  { %611 = vrsqrt.f32 %v445_v14 }
 0x241   :  { %v610_v15 = vpop.eup %609 }
 0x242   :  { %v448_v17 = vmul.f32 %v610_v15, %v434_v3 }
 0x244   :  { %v457_v19 = vmul.f32 %v521_v16, %v448_v17 }
 0x245   :  { %v612_v20 = vpop.eup %611 }
 0x246   :  { %v449_v21 = vmul.f32 %v612_v20, %v435_v7  ;;  %v466_v22 = vadd.f32 %v522_v18, %v457_v19 }
 0x248   :  { %v458_v23 = vmul.f32 %v521_v16, %v449_v21  ;;  %468 = vst [vmem:[#allocation8] sm:$0xff] %v466_v22 }
 0x24a   :  { %v467_v24 = vadd.f32 %v522_v18, %v458_v23 }
 0x24c   :  { %469 = vst [vmem:[#allocation8 + $0x8] sm:$0xff] %v467_v24 }
 0x24d   :  { %684 = shalt.err (!%p681_p5)
}
 0x24e   :  { %481 = dma.vmem_to_hbm [thread:$0]  %s476_s21, 256, %s777_s6, [#allocation4], %s706_s13, %s706_s13, %s707_s14  }
 0x24f   :  { %697 = dma.done.wait [#allocation4], 256  }
 0x250   :  { %698 = vsyncadd [#allocation4], 4294967040 }
 0x251   :  { %485 = vsyncpa [#allocation3], 1 }
 0x252   :  { %486 = vsyncpa [#allocation6], 1 }
 0x253   :  { %487 = vsyncpa [#allocation4], 1 }

</bundles_post_ra>
